<compile_context>
chip_gen: v7x
topology: tpu7x:2x2x1
jax: 0.10.0
libtpu: 0.0.40
codegen_flags: <defaults>
</compile_context>

<pallas_src>
import functools

import jax
import jax.numpy as jnp
from jax.experimental import pallas as pl
from jax.experimental.pallas import tpu as pltpu

EPS = 1e-5      # PyTorch nn.LayerNorm default
LANE = 128
SUBLANE = 8


def _round_up(x, m):
    return ((x + m - 1) // m) * m


def _device_vmem_capacity_bytes():
    try:
        return int(pltpu.get_tpu_info().vmem_capacity_bytes)
    except Exception:
        return 64 << 20   # conservative default (v7x per-TC VMEM)


def _use_bf16_silu():
    # bf16 VPU/EUP exist on v6e/v7x; keep f32 SiLU on older generations (v5e and earlier).
    try:
        kind = jax.devices()[0].device_kind.lower()
    except Exception:
        return False
    return ("v6" in kind) or ("v7" in kind)


def _layernorm(x, gamma, beta, inv_n, mask):
    # Centered two-pass variance (robust vs E[x^2]-mean^2 cancellation).
    # mask zeroes padded lanes so they contribute nothing to the variance or output.
    mean = jnp.sum(x, axis=-1, keepdims=True) * inv_n
    c = x - mean
    if mask is not None:
        c = c * mask
    var = jnp.sum(c * c, axis=-1, keepdims=True) * inv_n
    return c * jax.lax.rsqrt(var + EPS) * gamma + beta


def learning_block_kernel(
    x_ref,      # (TR, Fp)   row tile of input
    g1_ref,     # (1, Fp)    norm1 weight
    b1n_ref,    # (1, Fp)    norm1 bias
    w1_ref,     # (Fp, Hp)   ff[0] weight (in x out), bf16
    b1_ref,     # (1, Hp)    ff[0] bias, f32
    w2_ref,     # (Hp, Fp)   ff[3] weight (in x out), bf16
    b2_ref,     # (1, Fp)    ff[3] bias, f32
    g2_ref,     # (1, Fp)    norm2 weight
    b2n_ref,    # (1, Fp)    norm2 bias
    o_ref,      # (TR, Fp)
    *,
    n_feat,
    feat_padded,
    bf16_silu,
):
    x = x_ref[...].astype(jnp.float32)
    inv_n = 1.0 / float(n_feat)

    if feat_padded:
        mask = (jax.lax.broadcasted_iota(jnp.int32, (1, x.shape[-1]), 1)
                < n_feat).astype(jnp.float32)
    else:
        mask = None

    # norm1 (f32 statistics)
    x_norm = _layernorm(x, g1_ref[...], b1n_ref[...], inv_n, mask)

    # ff: Linear(F -> 4F) -> SiLU -> Dropout(eval: identity) -> Linear(4F -> F)
    # bf16 operands on the MXU, f32 accumulation.
    h = jnp.dot(x_norm.astype(jnp.bfloat16), w1_ref[...],
                preferred_element_type=jnp.float32) + b1_ref[...]

    if bf16_silu:
        hb = h.astype(jnp.bfloat16)          # halves VPU/EUP work + live bytes of (TR,Hp)
        act = hb * jax.nn.sigmoid(hb)
    else:
        act = (h * pl.reciprocal(1.0 + jnp.exp(-h), approx=True)).astype(jnp.bfloat16)

    x_tr = jnp.dot(act, w2_ref[...],
                   preferred_element_type=jnp.float32) + b2_ref[...]

    # residual (adds the *normalized* input, per the PyTorch module) + norm2
    y = _layernorm(x_tr + x_norm, g2_ref[...], b2n_ref[...], inv_n, mask)

    o_ref[...] = y.astype(o_ref.dtype)


def prepare_params(params):
    """Pad feature/hidden axes to multiples of 128 and cast matmul weights to bf16.

    Done once (outside the hot path) so each learning_block() call only moves
    activations through HBM, not the weights."""
    F = params["w1"].shape[0]
    H = params["w1"].shape[1]
    Fp = _round_up(max(F, LANE), LANE)
    Hp = _round_up(max(H, LANE), LANE)

    def pad2(a, rows, cols, dtype=jnp.float32):
        a = jnp.asarray(a, jnp.float32)
        return jnp.pad(a, ((0, rows - a.shape[0]), (0, cols - a.shape[1]))).astype(dtype)

    return {
        "F": F, "Fp": Fp, "Hp": Hp,
        "g1": pad2(params["g1"], 1, Fp),
        "b1n": pad2(params["b1n"], 1, Fp),
        "w1": pad2(params["w1"], Fp, Hp, jnp.bfloat16),
        "b1": pad2(params["b1"], 1, Hp),
        "w2": pad2(params["w2"], Hp, Fp, jnp.bfloat16),
        "b2": pad2(params["b2"], 1, Fp),
        "g2": pad2(params["g2"], 1, Fp),
        "b2n": pad2(params["b2n"], 1, Fp),
    }


def learning_block(x, prepared, *, row_tile=512):
    """x: (B, S, F) float32. prepared: output of prepare_params()."""
    B, S, F = x.shape
    assert F == prepared["F"], "feature size mismatch vs prepared params"
    Fp, Hp = prepared["Fp"], prepared["Hp"]
    R = B * S

    # Row tile: big (amortize ~0.35us per grid step), but ensure >= 2 grid steps
    # so both v7x TensorCores get work via the "parallel" axis.
    Rp8 = _round_up(R, SUBLANE)
    TR = min(row_tile, Rp8)
    if Rp8 > SUBLANE and Rp8 // TR < 2:
        TR = max(SUBLANE, _round_up(pl.cdiv(Rp8, 2), SUBLANE))
    Rp = pl.cdiv(R, TR) * TR
    n_steps = Rp // TR

    # Activation pad only when actually needed (skip the extra HBM pass otherwise).
    x2d = x.reshape(R, F).astype(jnp.float32)
    needs_pad = (Rp != R) or (Fp != F)
    if needs_pad:
        x2d = jnp.pad(x2d, ((0, Rp - R), (0, Fp - F)))

    # VMEM budget: double-buffered activation tiles, single-buffered weights
    # (keep 2x weight headroom for the double-buffered fallback), clamped to device capacity.
    weight_bytes = 2 * Fp * Hp * 2                  # w1 + w2 (bf16)
    vec_bytes = (6 * Fp + Hp) * 4
    act_bytes = 2 * 2 * TR * Fp * 4                 # in + out tiles, double-buffered
    interm_bytes = 3 * TR * Hp * 4 + 4 * TR * Fp * 4
    vmem_est = 2 * weight_bytes + 2 * vec_bytes + act_bytes + interm_bytes + (8 << 20)
    cap = _device_vmem_capacity_bytes()
    vmem_limit = int(min(max(vmem_est, 32 << 20), max(cap - (8 << 20), 16 << 20)))

    kernel = functools.partial(
        learning_block_kernel,
        n_feat=F,
        feat_padded=(Fp != F),
        bf16_silu=_use_bf16_silu(),
    )

    cost = pl.CostEstimate(
        flops=int(2 * 2 * Rp * Fp * Hp),            # two (Rp,Fp)x(Fp,Hp)-class matmuls
        transcendentals=int(Rp * Hp),               # sigmoid exp per hidden element
        bytes_accessed=int(2 * Rp * Fp * 4 + weight_bytes + vec_bytes),
    )

    row_spec = pl.BlockSpec((TR, Fp), lambda i: (i, 0))

    def build_call(single_buffer_weights):
        if single_buffer_weights:
            def const(shape):
                return pl.BlockSpec(shape, lambda i: (0, 0),
                                    pipeline_mode=pl.Buffered(1))
        else:
            def const(shape):
                return pl.BlockSpec(shape, lambda i: (0, 0))
        return pl.pallas_call(
            kernel,
            out_shape=jax.ShapeDtypeStruct((Rp, Fp), x.dtype),
            grid=(n_steps,),
            in_specs=[
                row_spec,
                const((1, Fp)), const((1, Fp)),
                const((Fp, Hp)), const((1, Hp)),
                const((Hp, Fp)), const((1, Fp)),
                const((1, Fp)), const((1, Fp)),
            ],
            out_specs=row_spec,
            compiler_params=pltpu.CompilerParams(
                dimension_semantics=("parallel",),
                vmem_limit_bytes=vmem_limit,
            ),
            cost_estimate=cost,
        )

    args = (x2d,
            prepared["g1"], prepared["b1n"],
            prepared["w1"], prepared["b1"],
            prepared["w2"], prepared["b2"],
            prepared["g2"], prepared["b2n"])

    try:
        # Single-buffer the grid-invariant weights/biases (halves their VMEM footprint).
        out = build_call(True)(*args)
    except Exception:
        # Fallback: default double-buffered specs if Buffered(1) is rejected.
        out = build_call(False)(*args)

    if needs_pad:
        out = out[:R, :F]
    return out.reshape(B, S, F)


def init_params(key, num_features):
    F = num_features
    k1, k2, k3, k4 = jax.random.split(key, 4)
    # LayerNorm init: weight=1, bias=0 (PyTorch default). Linear: U(-1/sqrt(fan_in), ...).
    scale1 = 1.0 / jnp.sqrt(F)
    scale2 = 1.0 / jnp.sqrt(4 * F)
    return {
        "g1": jnp.ones((1, F), jnp.float32),
        "b1n": jnp.zeros((1, F), jnp.float32),
        "w1": jax.random.uniform(k1, (F, 4 * F), jnp.float32, -scale1, scale1),
        "b1": jax.random.uniform(k2, (1, 4 * F), jnp.float32, -scale1, scale1),
        "w2": jax.random.uniform(k3, (4 * F, F), jnp.float32, -scale2, scale2),
        "b2": jax.random.uniform(k4, (1, F), jnp.float32, -scale2, scale2),
        "g2": jnp.ones((1, F), jnp.float32),
        "b2n": jnp.zeros((1, F), jnp.float32),
    }


def reference(x, params):
    """Pure-JAX f32 reference of the PyTorch forward (dropout in eval mode)."""
    def ln(v, g, b):
        m = jnp.mean(v, -1, keepdims=True)
        c = v - m
        var = jnp.mean(c * c, -1, keepdims=True)
        return c * jax.lax.rsqrt(var + EPS) * g[0] + b[0]

    xn = ln(x, params["g1"], params["b1n"])
    h = xn @ params["w1"] + params["b1"][0]
    h = h * jax.nn.sigmoid(h)
    xt = h @ params["w2"] + params["b2"][0]
    return ln(xt + xn, params["g2"], params["b2n"])


if __name__ == "__main__":
    B, S, F = 2, 8, 32  # num_features = 32
    key = jax.random.PRNGKey(0)
    kx, kp = jax.random.split(key)
    x = jax.random.normal(kx, (B, S, F), jnp.float32)
    params = init_params(kp, F)
    prepared = prepare_params(params)   # one-time pad + bf16 cast of weights

    out = learning_block(x, prepared)
    out = jax.block_until_ready(out)

    ref = reference(x, params)
    assert out.shape == (B, S, F)
    # bf16 MXU operands vs f32 reference -> loosened tolerance.
    assert jnp.allclose(out, ref, atol=5e-2, rtol=5e-2), "mismatch vs reference"
    print("KERNEL_OK")
</pallas_src>

<mosaic_0001>
module attributes {stable_mosaic.version = 11 : i64} {
  func.func @learning_block_kernel(%arg0: i32, %arg1: memref<8x128xf32, #tpu.memory_space<vmem>>, %arg2: memref<1x128xf32, #tpu.memory_space<vmem>>, %arg3: memref<1x128xf32, #tpu.memory_space<vmem>>, %arg4: memref<128x128xbf16, #tpu.memory_space<vmem>>, %arg5: memref<1x128xf32, #tpu.memory_space<vmem>>, %arg6: memref<128x128xbf16, #tpu.memory_space<vmem>>, %arg7: memref<1x128xf32, #tpu.memory_space<vmem>>, %arg8: memref<1x128xf32, #tpu.memory_space<vmem>>, %arg9: memref<1x128xf32, #tpu.memory_space<vmem>>, %arg10: memref<8x128xf32, #tpu.memory_space<vmem>>) attributes {dimension_semantics = [#tpu.dimension_semantics<parallel>], iteration_bounds = array<i64: 2>, scalar_prefetch = 0 : i64, scratch_operands = 0 : i64, tpu.core_type = #tpu.core_type<tc>, window_params = [{transform_indices = @transform_0, window_bounds = array<i64: 8, 128>}, {pipeline_mode = #tpu.pipeline_mode<synchronous>, transform_indices = @transform_1, window_bounds = array<i64: 1, 128>}, {pipeline_mode = #tpu.pipeline_mode<synchronous>, transform_indices = @transform_2, window_bounds = array<i64: 1, 128>}, {pipeline_mode = #tpu.pipeline_mode<synchronous>, transform_indices = @transform_3, window_bounds = array<i64: 128, 128>}, {pipeline_mode = #tpu.pipeline_mode<synchronous>, transform_indices = @transform_4, window_bounds = array<i64: 1, 128>}, {pipeline_mode = #tpu.pipeline_mode<synchronous>, transform_indices = @transform_5, window_bounds = array<i64: 128, 128>}, {pipeline_mode = #tpu.pipeline_mode<synchronous>, transform_indices = @transform_6, window_bounds = array<i64: 1, 128>}, {pipeline_mode = #tpu.pipeline_mode<synchronous>, transform_indices = @transform_7, window_bounds = array<i64: 1, 128>}, {pipeline_mode = #tpu.pipeline_mode<synchronous>, transform_indices = @transform_8, window_bounds = array<i64: 1, 128>}, {transform_indices = @transform_9, window_bounds = array<i64: 8, 128>}]} {
    %c0 = arith.constant 0 : index
    %c0_0 = arith.constant 0 : index
    %0 = vector.load %arg1[%c0, %c0_0] : memref<8x128xf32, #tpu.memory_space<vmem>>, vector<8x128xf32>
    %1 = tpu.iota {dimensions = array<i32: 1>} : vector<1x128xi32>
    %c32_i32 = arith.constant 32 : i32
    %2 = vector.broadcast %c32_i32 : i32 to vector<1x128xi32>
    %3 = arith.cmpi slt, %1, %2 : vector<1x128xi32>
    %4 = arith.extui %3 : vector<1x128xi1> to vector<1x128xi32>
    %5 = arith.sitofp %4 : vector<1x128xi32> to vector<1x128xf32>
    %c0_1 = arith.constant 0 : index
    %c0_2 = arith.constant 0 : index
    %6 = vector.load %arg2[%c0_1, %c0_2] : memref<1x128xf32, #tpu.memory_space<vmem>>, vector<1x128xf32>
    %c0_3 = arith.constant 0 : index
    %c0_4 = arith.constant 0 : index
    %7 = vector.load %arg3[%c0_3, %c0_4] : memref<1x128xf32, #tpu.memory_space<vmem>>, vector<1x128xf32>
    %cst = arith.constant dense<0.000000e+00> : vector<8xf32>
    %8 = vector.multi_reduction <add>, %0, %cst [1] : vector<8x128xf32> to vector<8xf32>
    %9 = vector.shape_cast %8 : vector<8xf32> to vector<8x1xf32>
    %cst_5 = arith.constant 3.125000e-02 : f32
    %10 = vector.broadcast %cst_5 : f32 to vector<8x1xf32>
    %11 = arith.mulf %9, %10 : vector<8x1xf32>
    %12 = vector.broadcast %11 : vector<8x1xf32> to vector<8x128xf32>
    %13 = arith.subf %0, %12 : vector<8x128xf32>
    %14 = vector.broadcast %5 : vector<1x128xf32> to vector<8x128xf32>
    %15 = arith.mulf %13, %14 : vector<8x128xf32>
    %16 = arith.mulf %15, %15 : vector<8x128xf32>
    %cst_6 = arith.constant dense<0.000000e+00> : vector<8xf32>
    %17 = vector.multi_reduction <add>, %16, %cst_6 [1] : vector<8x128xf32> to vector<8xf32>
    %18 = vector.shape_cast %17 : vector<8xf32> to vector<8x1xf32>
    %cst_7 = arith.constant 3.125000e-02 : f32
    %19 = vector.broadcast %cst_7 : f32 to vector<8x1xf32>
    %20 = arith.mulf %18, %19 : vector<8x1xf32>
    %cst_8 = arith.constant 9.99999974E-6 : f32
    %21 = vector.broadcast %cst_8 : f32 to vector<8x1xf32>
    %22 = arith.addf %20, %21 : vector<8x1xf32>
    %23 = math.rsqrt %22 : vector<8x1xf32>
    %24 = vector.broadcast %23 : vector<8x1xf32> to vector<8x128xf32>
    %25 = arith.mulf %15, %24 : vector<8x128xf32>
    %26 = vector.broadcast %6 : vector<1x128xf32> to vector<8x128xf32>
    %27 = arith.mulf %25, %26 : vector<8x128xf32>
    %28 = vector.broadcast %7 : vector<1x128xf32> to vector<8x128xf32>
    %29 = arith.addf %27, %28 : vector<8x128xf32>
    %30 = arith.truncf %29 : vector<8x128xf32> to vector<8x128xbf16>
    %c0_9 = arith.constant 0 : index
    %c0_10 = arith.constant 0 : index
    %31 = vector.load %arg4[%c0_9, %c0_10] : memref<128x128xbf16, #tpu.memory_space<vmem>>, vector<128x128xbf16>
    %cst_11 = arith.constant dense<0.000000e+00> : vector<8x128xf32>
    %32 = tpu.matmul %30, %31, %cst_11 {dimension_numbers = #tpu.dot_dimension_numbers<[1], [0], [0], [1], [0, 0, 1, 1], [], []>} : vector<8x128xbf16>, vector<128x128xbf16>, vector<8x128xf32> -> vector<8x128xf32>
    %c0_12 = arith.constant 0 : index
    %c0_13 = arith.constant 0 : index
    %33 = vector.load %arg5[%c0_12, %c0_13] : memref<1x128xf32, #tpu.memory_space<vmem>>, vector<1x128xf32>
    %34 = vector.broadcast %33 : vector<1x128xf32> to vector<8x128xf32>
    %35 = arith.addf %32, %34 : vector<8x128xf32>
    %cst_14 = arith.constant 0.000000e+00 : f32
    %36 = vector.broadcast %cst_14 : f32 to vector<8x128xf32>
    %37 = arith.subf %36, %35 : vector<8x128xf32>
    %38 = math.exp %37 : vector<8x128xf32>
    %cst_15 = arith.constant 1.000000e+00 : f32
    %39 = vector.broadcast %cst_15 : f32 to vector<8x128xf32>
    %40 = arith.addf %39, %38 : vector<8x128xf32>
    %41 = tpu.reciprocal %40 {approx = true} : vector<8x128xf32> -> vector<8x128xf32>
    %42 = arith.mulf %35, %41 : vector<8x128xf32>
    %43 = arith.truncf %42 : vector<8x128xf32> to vector<8x128xbf16>
    %c0_16 = arith.constant 0 : index
    %c0_17 = arith.constant 0 : index
    %44 = vector.load %arg6[%c0_16, %c0_17] : memref<128x128xbf16, #tpu.memory_space<vmem>>, vector<128x128xbf16>
    %cst_18 = arith.constant dense<0.000000e+00> : vector<8x128xf32>
    %45 = tpu.matmul %43, %44, %cst_18 {dimension_numbers = #tpu.dot_dimension_numbers<[1], [0], [0], [1], [0, 0, 1, 1], [], []>} : vector<8x128xbf16>, vector<128x128xbf16>, vector<8x128xf32> -> vector<8x128xf32>
    %c0_19 = arith.constant 0 : index
    %c0_20 = arith.constant 0 : index
    %46 = vector.load %arg7[%c0_19, %c0_20] : memref<1x128xf32, #tpu.memory_space<vmem>>, vector<1x128xf32>
    %47 = vector.broadcast %46 : vector<1x128xf32> to vector<8x128xf32>
    %48 = arith.addf %45, %47 : vector<8x128xf32>
    %49 = arith.addf %48, %29 : vector<8x128xf32>
    %c0_21 = arith.constant 0 : index
    %c0_22 = arith.constant 0 : index
    %50 = vector.load %arg8[%c0_21, %c0_22] : memref<1x128xf32, #tpu.memory_space<vmem>>, vector<1x128xf32>
    %c0_23 = arith.constant 0 : index
    %c0_24 = arith.constant 0 : index
    %51 = vector.load %arg9[%c0_23, %c0_24] : memref<1x128xf32, #tpu.memory_space<vmem>>, vector<1x128xf32>
    %cst_25 = arith.constant dense<0.000000e+00> : vector<8xf32>
    %52 = vector.multi_reduction <add>, %49, %cst_25 [1] : vector<8x128xf32> to vector<8xf32>
    %53 = vector.shape_cast %52 : vector<8xf32> to vector<8x1xf32>
    %cst_26 = arith.constant 3.125000e-02 : f32
    %54 = vector.broadcast %cst_26 : f32 to vector<8x1xf32>
    %55 = arith.mulf %53, %54 : vector<8x1xf32>
    %56 = vector.broadcast %55 : vector<8x1xf32> to vector<8x128xf32>
    %57 = arith.subf %49, %56 : vector<8x128xf32>
    %58 = vector.broadcast %5 : vector<1x128xf32> to vector<8x128xf32>
    %59 = arith.mulf %57, %58 : vector<8x128xf32>
    %60 = arith.mulf %59, %59 : vector<8x128xf32>
    %cst_27 = arith.constant dense<0.000000e+00> : vector<8xf32>
    %61 = vector.multi_reduction <add>, %60, %cst_27 [1] : vector<8x128xf32> to vector<8xf32>
    %62 = vector.shape_cast %61 : vector<8xf32> to vector<8x1xf32>
    %cst_28 = arith.constant 3.125000e-02 : f32
    %63 = vector.broadcast %cst_28 : f32 to vector<8x1xf32>
    %64 = arith.mulf %62, %63 : vector<8x1xf32>
    %cst_29 = arith.constant 9.99999974E-6 : f32
    %65 = vector.broadcast %cst_29 : f32 to vector<8x1xf32>
    %66 = arith.addf %64, %65 : vector<8x1xf32>
    %67 = math.rsqrt %66 : vector<8x1xf32>
    %68 = vector.broadcast %67 : vector<8x1xf32> to vector<8x128xf32>
    %69 = arith.mulf %59, %68 : vector<8x128xf32>
    %70 = vector.broadcast %50 : vector<1x128xf32> to vector<8x128xf32>
    %71 = arith.mulf %69, %70 : vector<8x128xf32>
    %72 = vector.broadcast %51 : vector<1x128xf32> to vector<8x128xf32>
    %73 = arith.addf %71, %72 : vector<8x128xf32>
    %c0_30 = arith.constant 0 : index
    %c0_31 = arith.constant 0 : index
    %74 = vector.load %arg10[%c0_30, %c0_31] : memref<8x128xf32, #tpu.memory_space<vmem>>, vector<8x128xf32>
    tpu.vector_store %arg10[%c0_30, %c0_31], %73 {strides = array<i32>} : memref<8x128xf32, #tpu.memory_space<vmem>>, vector<8x128xf32>,
    return
  }
  func.func @transform_0(%arg0: i32) -> (i32, i32) {
    %c0_i32 = arith.constant 0 : i32
    %c0_i32_0 = arith.constant 0 : i32
    return %arg0, %c0_i32 : i32, i32
  }
  func.func @transform_1(%arg0: i32) -> (i32, i32) {
    %c0_i32 = arith.constant 0 : i32
    %c0_i32_0 = arith.constant 0 : i32
    %c0_i32_1 = arith.constant 0 : i32
    return %c0_i32, %c0_i32_0 : i32, i32
  }
  func.func @transform_2(%arg0: i32) -> (i32, i32) {
    %c0_i32 = arith.constant 0 : i32
    %c0_i32_0 = arith.constant 0 : i32
    %c0_i32_1 = arith.constant 0 : i32
    return %c0_i32, %c0_i32_0 : i32, i32
  }
  func.func @transform_3(%arg0: i32) -> (i32, i32) {
    %c0_i32 = arith.constant 0 : i32
    %c0_i32_0 = arith.constant 0 : i32
    %c0_i32_1 = arith.constant 0 : i32
    return %c0_i32, %c0_i32_0 : i32, i32
  }
  func.func @transform_4(%arg0: i32) -> (i32, i32) {
    %c0_i32 = arith.constant 0 : i32
    %c0_i32_0 = arith.constant 0 : i32
    %c0_i32_1 = arith.constant 0 : i32
    return %c0_i32, %c0_i32_0 : i32, i32
  }
  func.func @transform_5(%arg0: i32) -> (i32, i32) {
    %c0_i32 = arith.constant 0 : i32
    %c0_i32_0 = arith.constant 0 : i32
    %c0_i32_1 = arith.constant 0 : i32
    return %c0_i32, %c0_i32_0 : i32, i32
  }
  func.func @transform_6(%arg0: i32) -> (i32, i32) {
    %c0_i32 = arith.constant 0 : i32
    %c0_i32_0 = arith.constant 0 : i32
    %c0_i32_1 = arith.constant 0 : i32
    return %c0_i32, %c0_i32_0 : i32, i32
  }
  func.func @transform_7(%arg0: i32) -> (i32, i32) {
    %c0_i32 = arith.constant 0 : i32
    %c0_i32_0 = arith.constant 0 : i32
    %c0_i32_1 = arith.constant 0 : i32
    return %c0_i32, %c0_i32_0 : i32, i32
  }
  func.func @transform_8(%arg0: i32) -> (i32, i32) {
    %c0_i32 = arith.constant 0 : i32
    %c0_i32_0 = arith.constant 0 : i32
    %c0_i32_1 = arith.constant 0 : i32
    return %c0_i32, %c0_i32_0 : i32, i32
  }
  func.func @transform_9(%arg0: i32) -> (i32, i32) {
    %c0_i32 = arith.constant 0 : i32
    %c0_i32_0 = arith.constant 0 : i32
    return %arg0, %c0_i32 : i32, i32
  }
}

module attributes {stable_mosaic.version = 11 : i64} {
  func.func @learning_block_kernel(%arg0: i32, %arg1: memref<8x128xf32, #tpu.memory_space<vmem>>, %arg2: memref<1x128xf32, #tpu.memory_space<vmem>>, %arg3: memref<1x128xf32, #tpu.memory_space<vmem>>, %arg4: memref<128x128xbf16, #tpu.memory_space<vmem>>, %arg5: memref<1x128xf32, #tpu.memory_space<vmem>>, %arg6: memref<128x128xbf16, #tpu.memory_space<vmem>>, %arg7: memref<1x128xf32, #tpu.memory_space<vmem>>, %arg8: memref<1x128xf32, #tpu.memory_space<vmem>>, %arg9: memref<1x128xf32, #tpu.memory_space<vmem>>, %arg10: memref<8x128xf32, #tpu.memory_space<vmem>>) attributes {dimension_semantics = [#tpu.dimension_semantics<parallel>], iteration_bounds = array<i64: 2>, scalar_prefetch = 0 : i64, scratch_operands = 0 : i64, tpu.core_type = #tpu.core_type<tc>, window_params = [{transform_indices = @transform_0, window_bounds = array<i64: 8, 128>}, {pipeline_mode = #tpu.pipeline_mode<synchronous>, transform_indices = @transform_1, window_bounds = array<i64: 1, 128>}, {pipeline_mode = #tpu.pipeline_mode<synchronous>, transform_indices = @transform_2, window_bounds = array<i64: 1, 128>}, {pipeline_mode = #tpu.pipeline_mode<synchronous>, transform_indices = @transform_3, window_bounds = array<i64: 128, 128>}, {pipeline_mode = #tpu.pipeline_mode<synchronous>, transform_indices = @transform_4, window_bounds = array<i64: 1, 128>}, {pipeline_mode = #tpu.pipeline_mode<synchronous>, transform_indices = @transform_5, window_bounds = array<i64: 128, 128>}, {pipeline_mode = #tpu.pipeline_mode<synchronous>, transform_indices = @transform_6, window_bounds = array<i64: 1, 128>}, {pipeline_mode = #tpu.pipeline_mode<synchronous>, transform_indices = @transform_7, window_bounds = array<i64: 1, 128>}, {pipeline_mode = #tpu.pipeline_mode<synchronous>, transform_indices = @transform_8, window_bounds = array<i64: 1, 128>}, {transform_indices = @transform_9, window_bounds = array<i64: 8, 128>}]} {
    %c0 = arith.constant 0 : index
    %c0_0 = arith.constant 0 : index
    %0 = vector.load %arg1[%c0, %c0_0] : memref<8x128xf32, #tpu.memory_space<vmem>>, vector<8x128xf32>
    %1 = tpu.iota {dimensions = array<i32: 1>} : vector<1x128xi32>
    %c32_i32 = arith.constant 32 : i32
    %2 = vector.broadcast %c32_i32 : i32 to vector<1x128xi32>
    %3 = arith.cmpi slt, %1, %2 : vector<1x128xi32>
    %4 = arith.extui %3 : vector<1x128xi1> to vector<1x128xi32>
    %5 = arith.sitofp %4 : vector<1x128xi32> to vector<1x128xf32>
    %c0_1 = arith.constant 0 : index
    %c0_2 = arith.constant 0 : index
    %6 = vector.load %arg2[%c0_1, %c0_2] : memref<1x128xf32, #tpu.memory_space<vmem>>, vector<1x128xf32>
    %c0_3 = arith.constant 0 : index
    %c0_4 = arith.constant 0 : index
    %7 = vector.load %arg3[%c0_3, %c0_4] : memref<1x128xf32, #tpu.memory_space<vmem>>, vector<1x128xf32>
    %cst = arith.constant dense<0.000000e+00> : vector<8xf32>
    %8 = vector.multi_reduction <add>, %0, %cst [1] : vector<8x128xf32> to vector<8xf32>
    %9 = vector.shape_cast %8 : vector<8xf32> to vector<8x1xf32>
    %cst_5 = arith.constant 3.125000e-02 : f32
    %10 = vector.broadcast %cst_5 : f32 to vector<8x1xf32>
    %11 = arith.mulf %9, %10 : vector<8x1xf32>
    %12 = vector.broadcast %11 : vector<8x1xf32> to vector<8x128xf32>
    %13 = arith.subf %0, %12 : vector<8x128xf32>
    %14 = vector.broadcast %5 : vector<1x128xf32> to vector<8x128xf32>
    %15 = arith.mulf %13, %14 : vector<8x128xf32>
    %16 = arith.mulf %15, %15 : vector<8x128xf32>
    %cst_6 = arith.constant dense<0.000000e+00> : vector<8xf32>
    %17 = vector.multi_reduction <add>, %16, %cst_6 [1] : vector<8x128xf32> to vector<8xf32>
    %18 = vector.shape_cast %17 : vector<8xf32> to vector<8x1xf32>
    %cst_7 = arith.constant 3.125000e-02 : f32
    %19 = vector.broadcast %cst_7 : f32 to vector<8x1xf32>
    %20 = arith.mulf %18, %19 : vector<8x1xf32>
    %cst_8 = arith.constant 9.99999974E-6 : f32
    %21 = vector.broadcast %cst_8 : f32 to vector<8x1xf32>
    %22 = arith.addf %20, %21 : vector<8x1xf32>
    %23 = math.rsqrt %22 : vector<8x1xf32>
    %24 = vector.broadcast %23 : vector<8x1xf32> to vector<8x128xf32>
    %25 = arith.mulf %15, %24 : vector<8x128xf32>
    %26 = vector.broadcast %6 : vector<1x128xf32> to vector<8x128xf32>
    %27 = arith.mulf %25, %26 : vector<8x128xf32>
    %28 = vector.broadcast %7 : vector<1x128xf32> to vector<8x128xf32>
    %29 = arith.addf %27, %28 : vector<8x128xf32>
    %30 = arith.truncf %29 : vector<8x128xf32> to vector<8x128xbf16>
    %c0_9 = arith.constant 0 : index
    %c0_10 = arith.constant 0 : index
    %31 = vector.load %arg4[%c0_9, %c0_10] : memref<128x128xbf16, #tpu.memory_space<vmem>>, vector<128x128xbf16>
    %cst_11 = arith.constant dense<0.000000e+00> : vector<8x128xf32>
    %32 = tpu.matmul %30, %31, %cst_11 {dimension_numbers = #tpu.dot_dimension_numbers<[1], [0], [0], [1], [0, 0, 1, 1], [], []>} : vector<8x128xbf16>, vector<128x128xbf16>, vector<8x128xf32> -> vector<8x128xf32>
    %c0_12 = arith.constant 0 : index
    %c0_13 = arith.constant 0 : index
    %33 = vector.load %arg5[%c0_12, %c0_13] : memref<1x128xf32, #tpu.memory_space<vmem>>, vector<1x128xf32>
    %34 = vector.broadcast %33 : vector<1x128xf32> to vector<8x128xf32>
    %35 = arith.addf %32, %34 : vector<8x128xf32>
    %cst_14 = arith.constant 0.000000e+00 : f32
    %36 = vector.broadcast %cst_14 : f32 to vector<8x128xf32>
    %37 = arith.subf %36, %35 : vector<8x128xf32>
    %38 = math.exp %37 : vector<8x128xf32>
    %cst_15 = arith.constant 1.000000e+00 : f32
    %39 = vector.broadcast %cst_15 : f32 to vector<8x128xf32>
    %40 = arith.addf %39, %38 : vector<8x128xf32>
    %41 = tpu.reciprocal %40 {approx = true} : vector<8x128xf32> -> vector<8x128xf32>
    %42 = arith.mulf %35, %41 : vector<8x128xf32>
    %43 = arith.truncf %42 : vector<8x128xf32> to vector<8x128xbf16>
    %c0_16 = arith.constant 0 : index
    %c0_17 = arith.constant 0 : index
    %44 = vector.load %arg6[%c0_16, %c0_17] : memref<128x128xbf16, #tpu.memory_space<vmem>>, vector<128x128xbf16>
    %cst_18 = arith.constant dense<0.000000e+00> : vector<8x128xf32>
    %45 = tpu.matmul %43, %44, %cst_18 {dimension_numbers = #tpu.dot_dimension_numbers<[1], [0], [0], [1], [0, 0, 1, 1], [], []>} : vector<8x128xbf16>, vector<128x128xbf16>, vector<8x128xf32> -> vector<8x128xf32>
    %c0_19 = arith.constant 0 : index
    %c0_20 = arith.constant 0 : index
    %46 = vector.load %arg7[%c0_19, %c0_20] : memref<1x128xf32, #tpu.memory_space<vmem>>, vector<1x128xf32>
    %47 = vector.broadcast %46 : vector<1x128xf32> to vector<8x128xf32>
    %48 = arith.addf %45, %47 : vector<8x128xf32>
    %49 = arith.addf %48, %29 : vector<8x128xf32>
    %c0_21 = arith.constant 0 : index
    %c0_22 = arith.constant 0 : index
    %50 = vector.load %arg8[%c0_21, %c0_22] : memref<1x128xf32, #tpu.memory_space<vmem>>, vector<1x128xf32>
    %c0_23 = arith.constant 0 : index
    %c0_24 = arith.constant 0 : index
    %51 = vector.load %arg9[%c0_23, %c0_24] : memref<1x128xf32, #tpu.memory_space<vmem>>, vector<1x128xf32>
    %cst_25 = arith.constant dense<0.000000e+00> : vector<8xf32>
    %52 = vector.multi_reduction <add>, %49, %cst_25 [1] : vector<8x128xf32> to vector<8xf32>
    %53 = vector.shape_cast %52 : vector<8xf32> to vector<8x1xf32>
    %cst_26 = arith.constant 3.125000e-02 : f32
    %54 = vector.broadcast %cst_26 : f32 to vector<8x1xf32>
    %55 = arith.mulf %53, %54 : vector<8x1xf32>
    %56 = vector.broadcast %55 : vector<8x1xf32> to vector<8x128xf32>
    %57 = arith.subf %49, %56 : vector<8x128xf32>
    %58 = vector.broadcast %5 : vector<1x128xf32> to vector<8x128xf32>
    %59 = arith.mulf %57, %58 : vector<8x128xf32>
    %60 = arith.mulf %59, %59 : vector<8x128xf32>
    %cst_27 = arith.constant dense<0.000000e+00> : vector<8xf32>
    %61 = vector.multi_reduction <add>, %60, %cst_27 [1] : vector<8x128xf32> to vector<8xf32>
    %62 = vector.shape_cast %61 : vector<8xf32> to vector<8x1xf32>
    %cst_28 = arith.constant 3.125000e-02 : f32
    %63 = vector.broadcast %cst_28 : f32 to vector<8x1xf32>
    %64 = arith.mulf %62, %63 : vector<8x1xf32>
    %cst_29 = arith.constant 9.99999974E-6 : f32
    %65 = vector.broadcast %cst_29 : f32 to vector<8x1xf32>
    %66 = arith.addf %64, %65 : vector<8x1xf32>
    %67 = math.rsqrt %66 : vector<8x1xf32>
    %68 = vector.broadcast %67 : vector<8x1xf32> to vector<8x128xf32>
    %69 = arith.mulf %59, %68 : vector<8x128xf32>
    %70 = vector.broadcast %50 : vector<1x128xf32> to vector<8x128xf32>
    %71 = arith.mulf %69, %70 : vector<8x128xf32>
    %72 = vector.broadcast %51 : vector<1x128xf32> to vector<8x128xf32>
    %73 = arith.addf %71, %72 : vector<8x128xf32>
    %c0_30 = arith.constant 0 : index
    %c0_31 = arith.constant 0 : index
    %74 = vector.load %arg10[%c0_30, %c0_31] : memref<8x128xf32, #tpu.memory_space<vmem>>, vector<8x128xf32>
    tpu.vector_store %arg10[%c0_30, %c0_31], %73 {strides = array<i32>} : memref<8x128xf32, #tpu.memory_space<vmem>>, vector<8x128xf32>,
    return
  }
  func.func @transform_0(%arg0: i32) -> (i32, i32) {
    %c0_i32 = arith.constant 0 : i32
    %c0_i32_0 = arith.constant 0 : i32
    return %arg0, %c0_i32 : i32, i32
  }
  func.func @transform_1(%arg0: i32) -> (i32, i32) {
    %c0_i32 = arith.constant 0 : i32
    %c0_i32_0 = arith.constant 0 : i32
    %c0_i32_1 = arith.constant 0 : i32
    return %c0_i32, %c0_i32_0 : i32, i32
  }
  func.func @transform_2(%arg0: i32) -> (i32, i32) {
    %c0_i32 = arith.constant 0 : i32
    %c0_i32_0 = arith.constant 0 : i32
    %c0_i32_1 = arith.constant 0 : i32
    return %c0_i32, %c0_i32_0 : i32, i32
  }
  func.func @transform_3(%arg0: i32) -> (i32, i32) {
    %c0_i32 = arith.constant 0 : i32
    %c0_i32_0 = arith.constant 0 : i32
    %c0_i32_1 = arith.constant 0 : i32
    return %c0_i32, %c0_i32_0 : i32, i32
  }
  func.func @transform_4(%arg0: i32) -> (i32, i32) {
    %c0_i32 = arith.constant 0 : i32
    %c0_i32_0 = arith.constant 0 : i32
    %c0_i32_1 = arith.constant 0 : i32
    return %c0_i32, %c0_i32_0 : i32, i32
  }
  func.func @transform_5(%arg0: i32) -> (i32, i32) {
    %c0_i32 = arith.constant 0 : i32
    %c0_i32_0 = arith.constant 0 : i32
    %c0_i32_1 = arith.constant 0 : i32
    return %c0_i32, %c0_i32_0 : i32, i32
  }
  func.func @transform_6(%arg0: i32) -> (i32, i32) {
    %c0_i32 = arith.constant 0 : i32
    %c0_i32_0 = arith.constant 0 : i32
    %c0_i32_1 = arith.constant 0 : i32
    return %c0_i32, %c0_i32_0 : i32, i32
  }
  func.func @transform_7(%arg0: i32) -> (i32, i32) {
    %c0_i32 = arith.constant 0 : i32
    %c0_i32_0 = arith.constant 0 : i32
    %c0_i32_1 = arith.constant 0 : i32
    return %c0_i32, %c0_i32_0 : i32, i32
  }
  func.func @transform_8(%arg0: i32) -> (i32, i32) {
    %c0_i32 = arith.constant 0 : i32
    %c0_i32_0 = arith.constant 0 : i32
    %c0_i32_1 = arith.constant 0 : i32
    return %c0_i32, %c0_i32_0 : i32, i32
  }
  func.func @transform_9(%arg0: i32) -> (i32, i32) {
    %c0_i32 = arith.constant 0 : i32
    %c0_i32_0 = arith.constant 0 : i32
    return %arg0, %c0_i32 : i32, i32
  }
}

</mosaic_0001>

<bundles_post_ra>
// kernel: tpu_custom_call.1
= control target key start
LH: loop header
LB: loop body
LE: loop exit
PB: predicated region body
PF: predicated region fallthrough
CT: control target
= control target key end

     0   :  { %14 = vsyncpa [#allocation3], 0  ;;  %s1457_s0 = inlined_call_operand.hbm [shape: f32[16,128], index: 0, kind: input, shape index: {}]   ;;  %s1458_s1 = inlined_call_operand.vmem [shape: f32[1,128], index: 1, kind: input, shape index: {}]   ;;  %s1459_s2 = inlined_call_operand.vmem [shape: f32[1,128], index: 2, kind: input, shape index: {}]   ;;  %s1460_s3 = inlined_call_operand.hbm [shape: bf16[128,128], index: 3, kind: input, shape index: {}]   ;;  %s1461_s4 = inlined_call_operand.vmem [shape: f32[1,128], index: 4, kind: input, shape index: {}]   ;;  %s1462_s5 = inlined_call_operand.hbm [shape: bf16[128,128], index: 5, kind: input, shape index: {}]   ;;  %s1463_s6 = inlined_call_operand.vmem [shape: f32[1,128], index: 6, kind: input, shape index: {}]   ;;  %s1464_s7 = inlined_call_operand.vmem [shape: f32[1,128], index: 7, kind: input, shape index: {}]   ;;  %s1465_s8 = inlined_call_operand.vmem [shape: f32[1,128], index: 8, kind: input, shape index: {}]   ;;  %s1466_s9 = inlined_call_operand.hbm [shape: f32[16,128], index: 9, kind: output, shape index: {}]  }
   0x1   :  { %16 = vsyncpa [#allocation3 + $0x1], 0 }
   0x2   :  { %17 = vsyncpa [#allocation6], 0 }
   0x3   :  { %18 = vsyncpa [#allocation4], 0 }
   0x4   :  { %20 = vsyncpa [#allocation4 + $0x1], 0  ;;  %s1183_s30 = smov 0   ;;  %s1185_s10 = smov 0  }
   0x5   :  { %s1187_s11 = smov 0   ;;  %s1189_s12 = smov 0  }
   0x6 LB: > { %s1204_s13 = sadd.s32 4294967295, %s1123_s12   ;;  %s775_s14 = sadd.s32 4294967294, %s1123_s12   ;;  %s1123_s12 = sphi %s1189_s12, %s1489_s12   ;;  %s1119_s11 = sphi %s1187_s11, %s1488_s11   ;;  %s1115_s10 = sphi %s1185_s10, %s1487_s10   ;;  %s1111_s30 = sphi %s1183_s30, %s1486_s30  }
   0x7   : > { %p46_p0 = scmp.ne.s32.totalorder %s1115_s10, %s1111_s30  ;;  %p1467_p1 = scmp.eq.s32.totalorder %s1204_s13, 0 }
   0x8   : > { %p244_p3 = scmp.eq.s32.totalorder %s775_s14, 1  ;;  %p776_p5 = scmp.ge.s32.totalorder %s1123_s12, 1 }
   0x9   : > { %p1213_p4 = por %p1467_p1, %p46_p0  ;;  %p251_p7 = scmp.lt.s32.totalorder %s1123_s12, 3 }
   0xa   : > { %p1218_p6 = por %p244_p3, %p46_p0  ;;  %s1125_s18 = smov [#allocation5]  }
   0xb   : > { %s1471_s15 = scalar_select %p1213_p4, 1, 0 }
   0xc   : > { %s1472_s16 = scalar_select %p1218_p6, 1, 0 }
   0xd   : > { %p1223_p8 = pnand %p776_p5, %p251_p7  ;;  %s269_s19 = sshll.u32 %s1125_s18, 4  ;;  %s1227_s19 = int_to_ptr.vmem [resolvable:$true] %s269_s19 }
   0xe   : > { %1473 = sst [smem:[#allocation12_spill]] %s1472_s16  ;;  %s1126_s21 = smov [#allocation7]  }
   0xf   : > { %p884_p9 = pneg %p1223_p8  ;;  %s285_s22 = sshll.u32 %s1126_s21, 4  ;;  %s1238_s22 = int_to_ptr.vmem [resolvable:$true] %s285_s22 }
  0x10   : > { %s967_s25 = scalar_lea.hbm %s1460_s3, 1024 }
  0x11   : > { %p1234_p11 = pnand %p884_p9, %p1467_p1  ;;  %p968_p12 = scmp.ne.s32.totalorder %s1460_s3, %s967_s25 }
  0x12   : > { %p974_p5 = scmp.lt.u32.totalorder %s967_s25, %s1460_s3 }
  0x13   : > { %p969_p13 = pneg %p1234_p11 }
  0x15   : > { %p970_p0 = pnand %p969_p13, %p968_p12 }
  0x17   : > { %p971_p3 = pneg %p970_p0 }
  0x19   : > { %p976_p7 = pnand %p974_p5, %p971_p3 }
  0x1b   : > { %979 = shalt.err (!%p976_p7)
}
  0x1c   : > { %s980_s14 = scalar_lea.vmem %s1227_s19, 1024  ;;  %p988_p2 = scmp.lt.s32.totalorder %s1227_s19, %s1227_s19 }
  0x1d   : > { %p981_p9 = scmp.ne.s32.totalorder %s1227_s19, %s980_s14  ;;  %p989_p12 = scmp.lt.s32.totalorder %s980_s14, %s980_s14 }
  0x1f   : > { %p983_p10 = pnand %p981_p9, %p969_p13  ;;  %p990_p0 = por %p989_p12, %p988_p2 }
  0x21   : > { %p984_p1 = pneg %p983_p10 }
  0x23   : > { %p991_p6 = pnand %p990_p0, %p984_p1 }
  0x25   : > { %994 = shalt.err (!%p991_p6)
}
  0x26   : > { %s1127_s18 = smov 64   ;;  %s1128_s21 = smov 4  }
  0x27   : > { %887 = dma.hbm_to_vmem [thread:$0]  (!%p1234_p11), %s1460_s3, 1024, %s1227_s19, [#allocation6], %s1127_s18, %s1127_s18, %s1128_s21  }
  0x28   : > { %s995_s27 = scalar_lea.hbm %s1462_s5, 1024 }
  0x29   : > { %p996_p2 = scmp.ne.s32.totalorder %s1462_s5, %s995_s27  ;;  %p1002_p10 = scmp.lt.u32.totalorder %s995_s27, %s1462_s5 }
  0x2b   : > { %p998_p1 = pnand %p996_p2, %p969_p13 }
  0x2d   : > { %p999_p6 = pneg %p998_p1 }
  0x2f   : > { %p1004_p3 = pnand %p1002_p10, %p999_p6 }
  0x31   : > { %1007 = shalt.err (!%p1004_p3)
}
  0x32   : > { %s1008_s19 = scalar_lea.vmem %s1238_s22, 1024  ;;  %p1016_p12 = scmp.lt.s32.totalorder %s1238_s22, %s1238_s22 }
  0x33   : > { %p1009_p5 = scmp.ne.s32.totalorder %s1238_s22, %s1008_s19  ;;  %p1017_p0 = scmp.lt.s32.totalorder %s1008_s19, %s1008_s19 }
  0x35   : > { %p1011_p7 = pnand %p1009_p5, %p969_p13  ;;  %p1018_p2 = por %p1017_p0, %p1016_p12 }
  0x37   : > { %p1012_p9 = pneg %p1011_p7 }
  0x39   : > { %p1019_p1 = pnand %p1018_p2, %p1012_p9 }
  0x3b   : > { %1022 = shalt.err (!%p1019_p1)
}
  0x3c   : > { %890 = dma.hbm_to_vmem [thread:$0]  (!%p1234_p11), %s1462_s5, 1024, %s1238_s22, [#allocation6], %s1127_s18, %s1127_s18, %s1128_s21  }
  0x3d   : > { %s1293_s24 = sadd.s32 1, %s1123_s12   ;;  %s33_s20 = sadd.s32 1, %s1119_s11 }
  0x3e   : > { %s30_s25 = ssub.s32 %s1123_s12, %s1293_s24  ;;  %p40_p13 = scmp.ne.s32.totalorder %s1119_s11, %s1115_s10 }
  0x3f   : > { %p31_p6 = scmp.eq.s32.totalorder %s30_s25, 0  ;;  %p41_p10 = scmp.eq.s32.totalorder %s1123_s12, 0 }
  0x40   : > { %p1476_p3 = scmp.eq.s32.totalorder %s1204_s13, 1  ;;  %p901_p7 = scmp.lt.s32.totalorder %s1123_s12, 2 }
  0x41   : > { %s1309_s27 = scalar_select %p31_p6, %s1119_s11, %s33_s20  }
  0x42   : > { %p1303_p5 = por %p1476_p3, %p40_p13  ;;  %p42_p9 = por %p41_p10, %p40_p13 }
  0x43   : > { %s308_s28 = sand.u32 1, %s1119_s11   ;;  %s781_s22 = sshll.u32 %s1123_s12, 7 }
  0x44   : > { %s1477_s26 = scalar_select %p1303_p5, 1, 0 }
  0x45   : > { %s780_s29 = sshll.u32 %s308_s28, 3  ;;  %s1316_s14 = scalar_lea.hbm %s1457_s0, %s781_s22 }
  0x46   : > { %s312_s19 = scalar_lea.vmem [#allocation2], %s780_s29  ;;  %p1320_p11 = pnand %p901_p7, %p42_p9 }
  0x47   : > { %s319_s16 = sshll.u32 %s312_s19, 4  ;;  %s309_s20 = scalar_lea.sflag [#allocation3], %s308_s28  ;;  %s1318_s16 = int_to_ptr.vmem [resolvable:$true] %s319_s16 }
  0x48   : > { %s1023_s25 = scalar_lea.hbm %s1316_s14, 128  ;;  %p1025_p0 = pneg %p1320_p11 }
  0x49   : > { %p1024_p12 = scmp.ne.s32.totalorder %s1316_s14, %s1023_s25  ;;  %s1028_s18 = scalar_lea.hbm %s1457_s0, 256 }
  0x4a   : > { %p1029_p13 = scmp.lt.u32.totalorder %s1316_s14, %s1457_s0  ;;  %p1030_p6 = scmp.lt.u32.totalorder %s1028_s18, %s1023_s25 }
  0x4b   : > { %p1026_p2 = pnand %p1025_p0, %p1024_p12  ;;  %p1032_p3 = scmp.lt.u32.totalorder %s1023_s25, %s1316_s14 }
  0x4c   : > { %p1031_p10 = por %p1030_p6, %p1029_p13 }
  0x4d   : > { %p1027_p1 = pneg %p1026_p2 }
  0x4e   : > { %p1033_p7 = por %p1032_p3, %p1031_p10 }
  0x50   : > { %p1034_p9 = pnand %p1033_p7, %p1027_p1 }
  0x52   : > { %1037 = shalt.err (!%p1034_p9)
}
  0x53   : > { %s1038_s28 = scalar_lea.vmem %s1318_s16, 128  ;;  %s1129_s22 = smov [#allocation2]  }
  0x54   : > { %p1039_p12 = scmp.ne.s32.totalorder %s1318_s16, %s1038_s28  ;;  %s1043_s29 = sshll.u32 %s1129_s22, 4  ;;  %s1044_s29 = int_to_ptr.vmem [resolvable:$false] %s1043_s29 }
  0x55   : > { %s1045_s21 = scalar_lea.vmem %s1044_s29, 256  ;;  %p1046_p4 = scmp.lt.s32.totalorder %s1318_s16, %s1044_s29 }
  0x56   : > { %p1041_p2 = pnand %p1039_p12, %p1025_p0  ;;  %p1047_p13 = scmp.lt.s32.totalorder %s1045_s21, %s1038_s28 }
  0x58   : > { %p1042_p5 = pneg %p1041_p2  ;;  %p1048_p6 = por %p1047_p13, %p1046_p4 }
  0x5a   : > { %p1049_p10 = pnand %p1048_p6, %p1042_p5 }
  0x5c   : > { %1052 = shalt.err (!%p1049_p10)
}
  0x5d   : > { %894 = dma.hbm_to_vmem [thread:$0]  (!%p1320_p11), %s1316_s14, 128, %s1318_s16, %s309_s20  }
  0x5e   : > { %328 = sbr.rel (%p1223_p8) target bundleno = 1210 (0x4ba), region = 56  ;;  %s1352_s25 = sand.u32 (!%p1223_p8), 1, %s1115_s10  }
  0x5f   : > { %s783_s18 = sshll.u32 (!%p1223_p8), %s1352_s25, 3  ;;  %s331_s19 = scalar_lea.sflag (!%p1223_p8), [#allocation3], %s1352_s25 }
  0x60   : > { %s334_s28 = scalar_lea.vmem (!%p1223_p8), [#allocation2], %s783_s18  ;;  %p1479_p4 = scmp.ne.s32.totalorder (!%p1223_p8), %s1471_s15, 0 }
  0x65   : > { %1098 = dma.done.wait (%p1479_p4), %s331_s19, 128  }
  0x66   : > { %1100 = vsyncadd (%p1479_p4), %s331_s19, 4294967168  ;;  %p1480_p5 = scmp.eq.s32.totalorder %s1204_s13, 0 }
  0x68   : > { %1102 = dma.done.wait (%p1480_p5), [#allocation6], 2048   ;;  %p1481_p8 = pmov %p1480_p5 }
  0x69   : > { %v378_v0 = vld [vmem:[%s334_s28] sm:$0xff]  ;;  %v1130_v1 = vmov 0.0   ;;  %v943_v2 = vld [vmem:[#allocation5] sm:$0xff]   ;;  %v944_v3 = vld [vmem:[#allocation5 + $0x8] sm:$0xff]   ;;  %v379_v4 = vlaneseq  ;;  %vm1131_vm1 = vmmov 0   ;;  %s811_s17 = sshll.u32 %s1204_s13, 7 }
  0x6a   : > { %1104 = vsyncadd (%p1481_p8), [#allocation6], 4294965248  ;;  %386 = vadd.xlane.f32.xlu0 %v378_v0  ;;  %832 = vmatprep.subr.bf16.mxu0 %v1130_v1  ;;  %v945_v12 = vld [vmem:[#allocation5 + $0x10] sm:$0xff]   ;;  %v946_v13 = vld [vmem:[#allocation5 + $0x18] sm:$0xff]   ;;  %s376_s14 = scalar_lea.vmem [#allocation8], %s783_s18  ;;  %s1413_s22 = scalar_lea.hbm %s1466_s9, %s811_s17 }
  0x6b   : > { %852 = vmatprep.subr.bf16.mxu1 %v1130_v1  ;;  %833 = vmatpush3.bf16.msra.mxu0 %v943_v2  ;;  %v380_v5 = vand.u32 127, %v379_v4  ;;  %v947_v14 = vld [vmem:[#allocation5 + $0x20] sm:$0xff]   ;;  %v948_v15 = vld [vmem:[#allocation5 + $0x28] sm:$0xff]   ;;  %v949_v16 = vld [vmem:[#allocation5 + $0x30] sm:$0xff]   ;;  %s686_s16 = sshll.u32 %s376_s14, 4  ;;  %s673_s29 = scalar_lea.sflag [#allocation4], %s1352_s25  ;;  %s1415_s16 = int_to_ptr.vmem [resolvable:$true] %s686_s16 }
  0x6c   : > { %834 = vmatprep.subr.bf16.mxu0 %v1130_v1  ;;  %848 = vmatprep.mubr.msk.bf16.mxu0 %vm1131_vm1, %v1130_v1  ;;  %v950_v17 = vld [vmem:[#allocation5 + $0x38] sm:$0xff]   ;;  %v788_v22 = vld [vmem:[%s1458_s1] ss:$0 sm:$0xff]  ;;  %v951_v28 = vld [vmem:[#allocation7] sm:$0xff]   ;;  %s1053_s21 = scalar_lea.vmem %s1415_s16, 128  ;;  %p1482_p0 = scmp.ne.s32.totalorder %s1477_s26, 0 }
  0x6d   : > { %vm381_vm0 = vcmp.lt.s32.totalorder %v380_v5, 32  ;;  %868 = vmatprep.mubr.msk.bf16.mxu1 %vm1131_vm1, %v1130_v1  ;;  %v789_v24 = vld [vmem:[%s1459_s2] ss:$0 sm:$0xff]  ;;  %853 = vmatpush3.bf16.msra.mxu1 %v951_v28  ;;  %v952_v29 = vld [vmem:[#allocation7 + $0x8] sm:$0xff]   ;;  %v954_v31 = vld [vmem:[#allocation7 + $0x18] sm:$0xff]   ;;  %p1054_p11 = scmp.ne.s32.totalorder %s1415_s16, %s1053_s21  ;;  %s1132_s13 = smov [#allocation8]  }
  0x6e   : > { %v1371_v8 = vsel %vm381_vm0, 1.0, %v1130_v1  ;;  %854 = vmatprep.subr.bf16.mxu1 %v1130_v1  ;;  %v953_v30 = vld [vmem:[#allocation7 + $0x10] sm:$0xff]   ;;  %v955_v32 = vld [vmem:[#allocation7 + $0x20] sm:$0xff]   ;;  %v956_v33 = vld [vmem:[#allocation7 + $0x28] sm:$0xff]   ;;  %s1057_s18 = sshll.u32 %s1132_s13, 4  ;;  %s1058_s18 = int_to_ptr.vmem [resolvable:$false] %s1057_s18 }
  0x6f   : > { %835 = vmatpush3.bf16.msra.mxu0 %v944_v3  ;;  %v957_v34 = vld [vmem:[#allocation7 + $0x30] sm:$0xff]   ;;  %v958_v35 = vld [vmem:[#allocation7 + $0x38] sm:$0xff]   ;;  %p1055_p1 = pnand %p1054_p11, %p1482_p0  ;;  %s1059_s19 = scalar_lea.vmem %s1058_s18, 256 }
  0x70   : > { %836 = vmatprep.subr.bf16.mxu0 %v1130_v1  ;;  %v790_v36 = vld [vmem:[%s1461_s4] ss:$0 sm:$0xff]  ;;  %p1060_p7 = scmp.lt.s32.totalorder %s1415_s16, %s1058_s18  ;;  %p1061_p9 = scmp.lt.s32.totalorder %s1059_s19, %s1053_s21 }
  0x71   : > { %855 = vmatpush3.bf16.msra.mxu1 %v952_v29  ;;  %v799_v49 = vld [vmem:[%s1463_s6] ss:$0 sm:$0xff]  ;;  %p1056_p3 = pneg %p1055_p1 }
  0x72   : > { %856 = vmatprep.subr.bf16.mxu1 %v1130_v1  ;;  %v809_v3 = vld [vmem:[%s1465_s8] ss:$0 sm:$0xff]  ;;  %p1062_p12 = por %p1061_p9, %p1060_p7 }
  0x73   : > { %837 = vmatpush3.bf16.msra.mxu0 %v945_v12 }
  0x74   : > { %838 = vmatprep.subr.bf16.mxu0 %v1130_v1  ;;  %p1063_p2 = pnand %p1062_p12, %p1056_p3 }
  0x75   : > { %857 = vmatpush3.bf16.msra.mxu1 %v953_v30 }
  0x76   : > { %858 = vmatprep.subr.bf16.mxu1 %v1130_v1 }
  0x77   : > { %839 = vmatpush3.bf16.msra.mxu0 %v946_v13 }
  0x78   : > { %840 = vmatprep.subr.bf16.mxu0 %v1130_v1 }
  0x79   : > { %859 = vmatpush3.bf16.msra.mxu1 %v954_v31 }
  0x7a   : > { %860 = vmatprep.subr.bf16.mxu1 %v1130_v1 }
  0x7b   : > { %841 = vmatpush3.bf16.msra.mxu0 %v947_v14 }
  0x7c   : > { %842 = vmatprep.subr.bf16.mxu0 %v1130_v1 }
  0x7d   : > { %861 = vmatpush3.bf16.msra.mxu1 %v955_v32 }
  0x7e   : > { %862 = vmatprep.subr.bf16.mxu1 %v1130_v1 }
  0x7f   : > { %843 = vmatpush3.bf16.msra.mxu0 %v948_v15 }
  0x80   : > { %844 = vmatprep.subr.bf16.mxu0 %v1130_v1 }
  0x81   : > { %863 = vmatpush3.bf16.msra.mxu1 %v956_v33 }
  0x82   : > { %864 = vmatprep.subr.bf16.mxu1 %v1130_v1 }
  0x83   : > { %845 = vmatpush3.bf16.msra.mxu0 %v949_v16 }
  0x84   : > { %846 = vmatprep.subr.bf16.mxu0 %v1130_v1 }
  0x85   : > { %865 = vmatpush3.bf16.msra.mxu1 %v957_v34 }
  0x86   : > { %866 = vmatprep.subr.bf16.mxu1 %v1130_v1  ;;  %v808_v1 = vld [vmem:[%s1464_s7] ss:$0 sm:$0xff] }
  0x87   : > { %847 = vmatpush3.bf16.msra.mxu0 %v950_v17 }
  0x89   : > { %867 = vmatpush3.bf16.msra.mxu1 %v958_v35 }
  0xf7   : > { %v387_v6 = vpop.xlane.xlu0 %386 }
  0xf8   : > { %v388_v7 = vmul.f32 0.03125, %v387_v6 }
  0xfa   : > { %v389_v9 = vsub.f32 %v378_v0, %v388_v7 }
  0xfc   : > { %v390_v10 = vmul.f32 %v1371_v8, %v389_v9 }
  0xfe   : > { %v391_v11 = vmul.f32 %v390_v10, %v390_v10 }
 0x100   : > { %392 = vadd.xlane.f32.xlu0 %v391_v11 }
 0x18d   : > { %v393_v18 = vpop.xlane.xlu0 %392 }
 0x18e   : > { %v394_v19 = vmul.f32 0.03125, %v393_v18 }
 0x190   : > { %v395_v20 = vadd.f32 1e-05, %v394_v19 }
 0x192   : > { %959 = vrsqrt.f32 %v395_v20 }
 0x19c   : > { %v960_v21 = vpop.eup %959 }
 0x19d   : > { %v397_v23 = vmul.f32 %v960_v21, %v390_v10 }
 0x19f   : > { %v404_v25 = vmul.f32 %v788_v22, %v397_v23 }
 0x1a1   : > { %v411_v26 = vadd.f32 %v789_v24, %v404_v25 }
 0x1a3   : > { %v412_v27 = vpack.c.bf16 %v411_v26, %v411_v26 }
 0x1a5   : > { %849 = vmatmul.mubr.bf16.vlgmr.msra.gmra.mrb[0].mxu0 %v412_v27 }
 0x278   : > { %v518_v37 = vpop.f32.mrb[0].mxu0 }
 0x279   : > { %v519_v38 = vadd.f32 %v790_v36, %v518_v37  ;;  %v850_v39 = vpop.f32.mrb[1].mxu0 }
 0x27a   : > { %v521_v40 = vpop.f32.mrb[2].mxu0 }
 0x27b   : > { %v524_v41 = vsub.f32 0.0, %v519_v38  ;;  %v851_v42 = vpop.f32.mrb[3].mxu0 }
 0x27d   : > { %v525_v43 = vmul.f32 1.442695, %v524_v41 }
 0x27f   : > { %961 = vpow2.f32 %v525_v43 }
 0x289   : > { %v962_v44 = vpop.eup %961 }
 0x28a   : > { %v527_v45 = vadd.f32 1.0, %v962_v44 }
 0x28c   : > { %963 = vrcp.f32 %v527_v45 }
 0x296   : > { %v964_v46 = vpop.eup %963 }
 0x297   : > { %v529_v47 = vmul.f32 %v964_v46, %v519_v38 }
 0x299   : > { %v530_v48 = vpack.c.bf16 %v529_v47, %v529_v47 }
 0x29b   : > { %869 = vmatmul.mubr.bf16.vlgmr.msra.gmra.mrb[0].mxu1 %v530_v48 }
 0x36e   : > { %v636_v50 = vpop.f32.mrb[0].mxu1 }
 0x36f   : > { %v637_v51 = vadd.f32 %v799_v49, %v636_v50  ;;  %v870_v52 = vpop.f32.mrb[1].mxu1 }
 0x370   : > { %v639_v53 = vpop.f32.mrb[2].mxu1 }
 0x371   : > { %v871_v54 = vpop.f32.mrb[3].mxu1  ;;  %v642_v55 = vadd.f32 %v637_v51, %v411_v26 }
 0x373   : > { %645 = vadd.xlane.f32.xlu1 %v642_v55 }
 0x400   : > { %v646_v56 = vpop.xlane.xlu1 %645 }
 0x401   : > { %v647_v57 = vmul.f32 0.03125, %v646_v56 }
 0x403   : > { %v648_v58 = vsub.f32 %v642_v55, %v647_v57 }
 0x405   : > { %v649_v59 = vmul.f32 %v1371_v8, %v648_v58 }
 0x407   : > { %v650_v60 = vmul.f32 %v649_v59, %v649_v59 }
 0x409   : > { %651 = vadd.xlane.f32.xlu1 %v650_v60 }
 0x496   : > { %v652_v61 = vpop.xlane.xlu1 %651 }
 0x497   : > { %v653_v62 = vmul.f32 0.03125, %v652_v61 }
 0x499   : > { %v654_v63 = vadd.f32 1e-05, %v653_v62 }
 0x49b   : > { %965 = vrsqrt.f32 %v654_v63 }
 0x4a5   : > { %v966_v0 = vpop.eup %965 }
 0x4a6   : > { %v656_v2 = vmul.f32 %v966_v0, %v649_v59 }
 0x4a8   : > { %v663_v4 = vmul.f32 %v808_v1, %v656_v2 }
 0x4aa   : > { %v670_v5 = vadd.f32 %v809_v3, %v663_v4 }
 0x4ac   : > { %671 = vst [vmem:[%s376_s14] sm:$0xff] %v670_v5 }
 0x4ad   : > { %1066 = shalt.err (!%p1063_p2)
}
 0x4ae   : > { %s1067_s25 = scalar_lea.hbm %s1413_s22, 128  ;;  %s1071_s17 = scalar_lea.hbm %s1466_s9, 256 }
 0x4af   : > { %p1068_p13 = scmp.ne.s32.totalorder %s1413_s22, %s1067_s25  ;;  %p1072_p4 = scmp.lt.u32.totalorder %s1413_s22, %s1466_s9 }
 0x4b0   : > { %p1073_p5 = scmp.lt.u32.totalorder %s1071_s17, %s1067_s25  ;;  %p1075_p11 = scmp.lt.u32.totalorder %s1067_s25, %s1413_s22 }
 0x4b1   : > { %p1069_p6 = pnand %p1068_p13, %p1482_p0 }
 0x4b2   : > { %p1074_p8 = por %p1073_p5, %p1072_p4 }
 0x4b3   : > { %p1070_p10 = pneg %p1069_p6 }
 0x4b4   : > { %p1076_p1 = por %p1075_p11, %p1074_p8 }
 0x4b6   : > { %p1077_p3 = pnand %p1076_p1, %p1070_p10 }
 0x4b8   : > { %1080 = shalt.err (!%p1077_p3)
}
 0x4b9   : > { %882 = dma.vmem_to_hbm [thread:$0]  (%p1482_p0), %s1415_s16, 128, %s1413_s22, %s673_s29  }
 0x4ba PF: > { %s1483_s20 = sld [smem:[#allocation12_spill]]  ;;  %s698_s21 = sand.u32 1, %s1111_s30  }
 0x4bb   : > { %p1485_p9 = scmp.ge.s32.totalorder %s1123_s12, 2  ;;  %s699_s13 = scalar_lea.sflag [#allocation4], %s698_s21 }
 0x4c0   : > { %p1484_p7 = scmp.ne.s32.totalorder %s1483_s20, 0 }
 0x4c2   : > { %p896_p12 = pnand %p1485_p9, %p1484_p7 }
 0x4c4   : > { %1106 = dma.done.wait (!%p896_p12), %s699_s13, 128  }
 0x4c5   : > { %1108 = vsyncadd (!%p896_p12), %s699_s13, 4294967168  ;;  %p23_p2 = scmp.ge.s32.totalorder %s1293_s24, 4   ;;  %s1486_s30 = smov %s1115_s10 }
 0x4c6   : > { %s1487_s10 = smov %s1119_s11  ;;  %s1488_s11 = smov %s1309_s27 }
 0x4c7   : > { %s1489_s12 = smov %s1293_s24  ;;  %25 = sbr.rel (!%p23_p2) target bundleno = 6 (0x6), region = 109 }
 0x4ce   :  { %704 = vsyncpa [#allocation3], 1 }
 0x4cf   :  { %706 = vsyncpa [#allocation3 + $0x1], 1 }
 0x4d0   :  { %707 = vsyncpa [#allocation6], 1 }
 0x4d1   :  { %708 = vsyncpa [#allocation4], 1 }
 0x4d2   :  { %710 = vsyncpa [#allocation4 + $0x1], 1 }

// kernel: tpu_custom_call.1
= control target key start
LH: loop header
LB: loop body
LE: loop exit
PB: predicated region body
PF: predicated region fallthrough
CT: control target
= control target key end

     0   :  { %14 = vsyncpa [#allocation3], 0  ;;  %s1457_s0 = inlined_call_operand.hbm [shape: f32[16,128], index: 0, kind: input, shape index: {}]   ;;  %s1458_s1 = inlined_call_operand.vmem [shape: f32[1,128], index: 1, kind: input, shape index: {}]   ;;  %s1459_s2 = inlined_call_operand.vmem [shape: f32[1,128], index: 2, kind: input, shape index: {}]   ;;  %s1460_s3 = inlined_call_operand.hbm [shape: bf16[128,128], index: 3, kind: input, shape index: {}]   ;;  %s1461_s4 = inlined_call_operand.vmem [shape: f32[1,128], index: 4, kind: input, shape index: {}]   ;;  %s1462_s5 = inlined_call_operand.hbm [shape: bf16[128,128], index: 5, kind: input, shape index: {}]   ;;  %s1463_s6 = inlined_call_operand.vmem [shape: f32[1,128], index: 6, kind: input, shape index: {}]   ;;  %s1464_s7 = inlined_call_operand.vmem [shape: f32[1,128], index: 7, kind: input, shape index: {}]   ;;  %s1465_s8 = inlined_call_operand.vmem [shape: f32[1,128], index: 8, kind: input, shape index: {}]   ;;  %s1466_s9 = inlined_call_operand.hbm [shape: f32[16,128], index: 9, kind: output, shape index: {}]  }
   0x1   :  { %16 = vsyncpa [#allocation3 + $0x1], 0 }
   0x2   :  { %17 = vsyncpa [#allocation6], 0 }
   0x3   :  { %18 = vsyncpa [#allocation4], 0 }
   0x4   :  { %20 = vsyncpa [#allocation4 + $0x1], 0  ;;  %s1183_s30 = smov 0   ;;  %s1185_s10 = smov 0  }
   0x5   :  { %s1187_s11 = smov 0   ;;  %s1189_s12 = smov 0  }
   0x6 LB: > { %s1204_s13 = sadd.s32 4294967295, %s1123_s12   ;;  %s775_s14 = sadd.s32 4294967294, %s1123_s12   ;;  %s1123_s12 = sphi %s1189_s12, %s1489_s12   ;;  %s1119_s11 = sphi %s1187_s11, %s1488_s11   ;;  %s1115_s10 = sphi %s1185_s10, %s1487_s10   ;;  %s1111_s30 = sphi %s1183_s30, %s1486_s30  }
   0x7   : > { %p46_p0 = scmp.ne.s32.totalorder %s1115_s10, %s1111_s30  ;;  %p1467_p1 = scmp.eq.s32.totalorder %s1204_s13, 0 }
   0x8   : > { %p244_p3 = scmp.eq.s32.totalorder %s775_s14, 1  ;;  %p776_p5 = scmp.ge.s32.totalorder %s1123_s12, 1 }
   0x9   : > { %p1213_p4 = por %p1467_p1, %p46_p0  ;;  %p251_p7 = scmp.lt.s32.totalorder %s1123_s12, 3 }
   0xa   : > { %p1218_p6 = por %p244_p3, %p46_p0  ;;  %s1125_s18 = smov [#allocation5]  }
   0xb   : > { %s1471_s15 = scalar_select %p1213_p4, 1, 0 }
   0xc   : > { %s1472_s16 = scalar_select %p1218_p6, 1, 0 }
   0xd   : > { %p1223_p8 = pnand %p776_p5, %p251_p7  ;;  %s269_s19 = sshll.u32 %s1125_s18, 4  ;;  %s1227_s19 = int_to_ptr.vmem [resolvable:$true] %s269_s19 }
   0xe   : > { %1473 = sst [smem:[#allocation12_spill]] %s1472_s16  ;;  %s1126_s21 = smov [#allocation7]  }
   0xf   : > { %p884_p9 = pneg %p1223_p8  ;;  %s285_s22 = sshll.u32 %s1126_s21, 4  ;;  %s1238_s22 = int_to_ptr.vmem [resolvable:$true] %s285_s22 }
  0x10   : > { %s967_s25 = scalar_lea.hbm %s1460_s3, 1024 }
  0x11   : > { %p1234_p11 = pnand %p884_p9, %p1467_p1  ;;  %p968_p12 = scmp.ne.s32.totalorder %s1460_s3, %s967_s25 }
  0x12   : > { %p974_p5 = scmp.lt.u32.totalorder %s967_s25, %s1460_s3 }
  0x13   : > { %p969_p13 = pneg %p1234_p11 }
  0x15   : > { %p970_p0 = pnand %p969_p13, %p968_p12 }
  0x17   : > { %p971_p3 = pneg %p970_p0 }
  0x19   : > { %p976_p7 = pnand %p974_p5, %p971_p3 }
  0x1b   : > { %979 = shalt.err (!%p976_p7)
}
  0x1c   : > { %s980_s14 = scalar_lea.vmem %s1227_s19, 1024  ;;  %p988_p2 = scmp.lt.s32.totalorder %s1227_s19, %s1227_s19 }
  0x1d   : > { %p981_p9 = scmp.ne.s32.totalorder %s1227_s19, %s980_s14  ;;  %p989_p12 = scmp.lt.s32.totalorder %s980_s14, %s980_s14 }
  0x1f   : > { %p983_p10 = pnand %p981_p9, %p969_p13  ;;  %p990_p0 = por %p989_p12, %p988_p2 }
  0x21   : > { %p984_p1 = pneg %p983_p10 }
  0x23   : > { %p991_p6 = pnand %p990_p0, %p984_p1 }
  0x25   : > { %994 = shalt.err (!%p991_p6)
}
  0x26   : > { %s1127_s18 = smov 64   ;;  %s1128_s21 = smov 4  }
  0x27   : > { %887 = dma.hbm_to_vmem [thread:$0]  (!%p1234_p11), %s1460_s3, 1024, %s1227_s19, [#allocation6], %s1127_s18, %s1127_s18, %s1128_s21  }
  0x28   : > { %s995_s27 = scalar_lea.hbm %s1462_s5, 1024 }
  0x29   : > { %p996_p2 = scmp.ne.s32.totalorder %s1462_s5, %s995_s27  ;;  %p1002_p10 = scmp.lt.u32.totalorder %s995_s27, %s1462_s5 }
  0x2b   : > { %p998_p1 = pnand %p996_p2, %p969_p13 }
  0x2d   : > { %p999_p6 = pneg %p998_p1 }
  0x2f   : > { %p1004_p3 = pnand %p1002_p10, %p999_p6 }
  0x31   : > { %1007 = shalt.err (!%p1004_p3)
}
  0x32   : > { %s1008_s19 = scalar_lea.vmem %s1238_s22, 1024  ;;  %p1016_p12 = scmp.lt.s32.totalorder %s1238_s22, %s1238_s22 }
  0x33   : > { %p1009_p5 = scmp.ne.s32.totalorder %s1238_s22, %s1008_s19  ;;  %p1017_p0 = scmp.lt.s32.totalorder %s1008_s19, %s1008_s19 }
  0x35   : > { %p1011_p7 = pnand %p1009_p5, %p969_p13  ;;  %p1018_p2 = por %p1017_p0, %p1016_p12 }
  0x37   : > { %p1012_p9 = pneg %p1011_p7 }
  0x39   : > { %p1019_p1 = pnand %p1018_p2, %p1012_p9 }
  0x3b   : > { %1022 = shalt.err (!%p1019_p1)
}
  0x3c   : > { %890 = dma.hbm_to_vmem [thread:$0]  (!%p1234_p11), %s1462_s5, 1024, %s1238_s22, [#allocation6], %s1127_s18, %s1127_s18, %s1128_s21  }
  0x3d   : > { %s1293_s24 = sadd.s32 1, %s1123_s12   ;;  %s33_s20 = sadd.s32 1, %s1119_s11 }
  0x3e   : > { %s30_s25 = ssub.s32 %s1123_s12, %s1293_s24  ;;  %p40_p13 = scmp.ne.s32.totalorder %s1119_s11, %s1115_s10 }
  0x3f   : > { %p31_p6 = scmp.eq.s32.totalorder %s30_s25, 0  ;;  %p41_p10 = scmp.eq.s32.totalorder %s1123_s12, 0 }
  0x40   : > { %p1476_p3 = scmp.eq.s32.totalorder %s1204_s13, 1  ;;  %p901_p7 = scmp.lt.s32.totalorder %s1123_s12, 2 }
  0x41   : > { %s1309_s27 = scalar_select %p31_p6, %s1119_s11, %s33_s20  }
  0x42   : > { %p1303_p5 = por %p1476_p3, %p40_p13  ;;  %p42_p9 = por %p41_p10, %p40_p13 }
  0x43   : > { %s308_s28 = sand.u32 1, %s1119_s11   ;;  %s781_s22 = sshll.u32 %s1123_s12, 7 }
  0x44   : > { %s1477_s26 = scalar_select %p1303_p5, 1, 0 }
  0x45   : > { %s780_s29 = sshll.u32 %s308_s28, 3  ;;  %s1316_s14 = scalar_lea.hbm %s1457_s0, %s781_s22 }
  0x46   : > { %s312_s19 = scalar_lea.vmem [#allocation2], %s780_s29  ;;  %p1320_p11 = pnand %p901_p7, %p42_p9 }
  0x47   : > { %s319_s16 = sshll.u32 %s312_s19, 4  ;;  %s309_s20 = scalar_lea.sflag [#allocation3], %s308_s28  ;;  %s1318_s16 = int_to_ptr.vmem [resolvable:$true] %s319_s16 }
  0x48   : > { %s1023_s25 = scalar_lea.hbm %s1316_s14, 128  ;;  %p1025_p0 = pneg %p1320_p11 }
  0x49   : > { %p1024_p12 = scmp.ne.s32.totalorder %s1316_s14, %s1023_s25  ;;  %s1028_s18 = scalar_lea.hbm %s1457_s0, 256 }
  0x4a   : > { %p1029_p13 = scmp.lt.u32.totalorder %s1316_s14, %s1457_s0  ;;  %p1030_p6 = scmp.lt.u32.totalorder %s1028_s18, %s1023_s25 }
  0x4b   : > { %p1026_p2 = pnand %p1025_p0, %p1024_p12  ;;  %p1032_p3 = scmp.lt.u32.totalorder %s1023_s25, %s1316_s14 }
  0x4c   : > { %p1031_p10 = por %p1030_p6, %p1029_p13 }
  0x4d   : > { %p1027_p1 = pneg %p1026_p2 }
  0x4e   : > { %p1033_p7 = por %p1032_p3, %p1031_p10 }
  0x50   : > { %p1034_p9 = pnand %p1033_p7, %p1027_p1 }
  0x52   : > { %1037 = shalt.err (!%p1034_p9)
}
  0x53   : > { %s1038_s28 = scalar_lea.vmem %s1318_s16, 128  ;;  %s1129_s22 = smov [#allocation2]  }
  0x54   : > { %p1039_p12 = scmp.ne.s32.totalorder %s1318_s16, %s1038_s28  ;;  %s1043_s29 = sshll.u32 %s1129_s22, 4  ;;  %s1044_s29 = int_to_ptr.vmem [resolvable:$false] %s1043_s29 }
  0x55   : > { %s1045_s21 = scalar_lea.vmem %s1044_s29, 256  ;;  %p1046_p4 = scmp.lt.s32.totalorder %s1318_s16, %s1044_s29 }
  0x56   : > { %p1041_p2 = pnand %p1039_p12, %p1025_p0  ;;  %p1047_p13 = scmp.lt.s32.totalorder %s1045_s21, %s1038_s28 }
  0x58   : > { %p1042_p5 = pneg %p1041_p2  ;;  %p1048_p6 = por %p1047_p13, %p1046_p4 }
  0x5a   : > { %p1049_p10 = pnand %p1048_p6, %p1042_p5 }
  0x5c   : > { %1052 = shalt.err (!%p1049_p10)
}
  0x5d   : > { %894 = dma.hbm_to_vmem [thread:$0]  (!%p1320_p11), %s1316_s14, 128, %s1318_s16, %s309_s20  }
  0x5e   : > { %328 = sbr.rel (%p1223_p8) target bundleno = 1210 (0x4ba), region = 56  ;;  %s1352_s25 = sand.u32 (!%p1223_p8), 1, %s1115_s10  }
  0x5f   : > { %s783_s18 = sshll.u32 (!%p1223_p8), %s1352_s25, 3  ;;  %s331_s19 = scalar_lea.sflag (!%p1223_p8), [#allocation3], %s1352_s25 }
  0x60   : > { %s334_s28 = scalar_lea.vmem (!%p1223_p8), [#allocation2], %s783_s18  ;;  %p1479_p4 = scmp.ne.s32.totalorder (!%p1223_p8), %s1471_s15, 0 }
  0x65   : > { %1098 = dma.done.wait (%p1479_p4), %s331_s19, 128  }
  0x66   : > { %1100 = vsyncadd (%p1479_p4), %s331_s19, 4294967168  ;;  %p1480_p5 = scmp.eq.s32.totalorder %s1204_s13, 0 }
  0x68   : > { %1102 = dma.done.wait (%p1480_p5), [#allocation6], 2048   ;;  %p1481_p8 = pmov %p1480_p5 }
  0x69   : > { %v378_v0 = vld [vmem:[%s334_s28] sm:$0xff]  ;;  %v1130_v1 = vmov 0.0   ;;  %v943_v2 = vld [vmem:[#allocation5] sm:$0xff]   ;;  %v944_v3 = vld [vmem:[#allocation5 + $0x8] sm:$0xff]   ;;  %v379_v4 = vlaneseq  ;;  %vm1131_vm1 = vmmov 0   ;;  %s811_s17 = sshll.u32 %s1204_s13, 7 }
  0x6a   : > { %1104 = vsyncadd (%p1481_p8), [#allocation6], 4294965248  ;;  %386 = vadd.xlane.f32.xlu0 %v378_v0  ;;  %832 = vmatprep.subr.bf16.mxu0 %v1130_v1  ;;  %v945_v12 = vld [vmem:[#allocation5 + $0x10] sm:$0xff]   ;;  %v946_v13 = vld [vmem:[#allocation5 + $0x18] sm:$0xff]   ;;  %s376_s14 = scalar_lea.vmem [#allocation8], %s783_s18  ;;  %s1413_s22 = scalar_lea.hbm %s1466_s9, %s811_s17 }
  0x6b   : > { %852 = vmatprep.subr.bf16.mxu1 %v1130_v1  ;;  %833 = vmatpush3.bf16.msra.mxu0 %v943_v2  ;;  %v380_v5 = vand.u32 127, %v379_v4  ;;  %v947_v14 = vld [vmem:[#allocation5 + $0x20] sm:$0xff]   ;;  %v948_v15 = vld [vmem:[#allocation5 + $0x28] sm:$0xff]   ;;  %v949_v16 = vld [vmem:[#allocation5 + $0x30] sm:$0xff]   ;;  %s686_s16 = sshll.u32 %s376_s14, 4  ;;  %s673_s29 = scalar_lea.sflag [#allocation4], %s1352_s25  ;;  %s1415_s16 = int_to_ptr.vmem [resolvable:$true] %s686_s16 }
  0x6c   : > { %834 = vmatprep.subr.bf16.mxu0 %v1130_v1  ;;  %848 = vmatprep.mubr.msk.bf16.mxu0 %vm1131_vm1, %v1130_v1  ;;  %v950_v17 = vld [vmem:[#allocation5 + $0x38] sm:$0xff]   ;;  %v788_v22 = vld [vmem:[%s1458_s1] ss:$0 sm:$0xff]  ;;  %v951_v28 = vld [vmem:[#allocation7] sm:$0xff]   ;;  %s1053_s21 = scalar_lea.vmem %s1415_s16, 128  ;;  %p1482_p0 = scmp.ne.s32.totalorder %s1477_s26, 0 }
  0x6d   : > { %vm381_vm0 = vcmp.lt.s32.totalorder %v380_v5, 32  ;;  %868 = vmatprep.mubr.msk.bf16.mxu1 %vm1131_vm1, %v1130_v1  ;;  %v789_v24 = vld [vmem:[%s1459_s2] ss:$0 sm:$0xff]  ;;  %853 = vmatpush3.bf16.msra.mxu1 %v951_v28  ;;  %v952_v29 = vld [vmem:[#allocation7 + $0x8] sm:$0xff]   ;;  %v954_v31 = vld [vmem:[#allocation7 + $0x18] sm:$0xff]   ;;  %p1054_p11 = scmp.ne.s32.totalorder %s1415_s16, %s1053_s21  ;;  %s1132_s13 = smov [#allocation8]  }
  0x6e   : > { %v1371_v8 = vsel %vm381_vm0, 1.0, %v1130_v1  ;;  %854 = vmatprep.subr.bf16.mxu1 %v1130_v1  ;;  %v953_v30 = vld [vmem:[#allocation7 + $0x10] sm:$0xff]   ;;  %v955_v32 = vld [vmem:[#allocation7 + $0x20] sm:$0xff]   ;;  %v956_v33 = vld [vmem:[#allocation7 + $0x28] sm:$0xff]   ;;  %s1057_s18 = sshll.u32 %s1132_s13, 4  ;;  %s1058_s18 = int_to_ptr.vmem [resolvable:$false] %s1057_s18 }
  0x6f   : > { %835 = vmatpush3.bf16.msra.mxu0 %v944_v3  ;;  %v957_v34 = vld [vmem:[#allocation7 + $0x30] sm:$0xff]   ;;  %v958_v35 = vld [vmem:[#allocation7 + $0x38] sm:$0xff]   ;;  %p1055_p1 = pnand %p1054_p11, %p1482_p0  ;;  %s1059_s19 = scalar_lea.vmem %s1058_s18, 256 }
  0x70   : > { %836 = vmatprep.subr.bf16.mxu0 %v1130_v1  ;;  %v790_v36 = vld [vmem:[%s1461_s4] ss:$0 sm:$0xff]  ;;  %p1060_p7 = scmp.lt.s32.totalorder %s1415_s16, %s1058_s18  ;;  %p1061_p9 = scmp.lt.s32.totalorder %s1059_s19, %s1053_s21 }
  0x71   : > { %855 = vmatpush3.bf16.msra.mxu1 %v952_v29  ;;  %v799_v49 = vld [vmem:[%s1463_s6] ss:$0 sm:$0xff]  ;;  %p1056_p3 = pneg %p1055_p1 }
  0x72   : > { %856 = vmatprep.subr.bf16.mxu1 %v1130_v1  ;;  %v809_v3 = vld [vmem:[%s1465_s8] ss:$0 sm:$0xff]  ;;  %p1062_p12 = por %p1061_p9, %p1060_p7 }
  0x73   : > { %837 = vmatpush3.bf16.msra.mxu0 %v945_v12 }
  0x74   : > { %838 = vmatprep.subr.bf16.mxu0 %v1130_v1  ;;  %p1063_p2 = pnand %p1062_p12, %p1056_p3 }
  0x75   : > { %857 = vmatpush3.bf16.msra.mxu1 %v953_v30 }
  0x76   : > { %858 = vmatprep.subr.bf16.mxu1 %v1130_v1 }
  0x77   : > { %839 = vmatpush3.bf16.msra.mxu0 %v946_v13 }
  0x78   : > { %840 = vmatprep.subr.bf16.mxu0 %v1130_v1 }
  0x79   : > { %859 = vmatpush3.bf16.msra.mxu1 %v954_v31 }
  0x7a   : > { %860 = vmatprep.subr.bf16.mxu1 %v1130_v1 }
  0x7b   : > { %841 = vmatpush3.bf16.msra.mxu0 %v947_v14 }
  0x7c   : > { %842 = vmatprep.subr.bf16.mxu0 %v1130_v1 }
  0x7d   : > { %861 = vmatpush3.bf16.msra.mxu1 %v955_v32 }
  0x7e   : > { %862 = vmatprep.subr.bf16.mxu1 %v1130_v1 }
  0x7f   : > { %843 = vmatpush3.bf16.msra.mxu0 %v948_v15 }
  0x80   : > { %844 = vmatprep.subr.bf16.mxu0 %v1130_v1 }
  0x81   : > { %863 = vmatpush3.bf16.msra.mxu1 %v956_v33 }
  0x82   : > { %864 = vmatprep.subr.bf16.mxu1 %v1130_v1 }
  0x83   : > { %845 = vmatpush3.bf16.msra.mxu0 %v949_v16 }
  0x84   : > { %846 = vmatprep.subr.bf16.mxu0 %v1130_v1 }
  0x85   : > { %865 = vmatpush3.bf16.msra.mxu1 %v957_v34 }
  0x86   : > { %866 = vmatprep.subr.bf16.mxu1 %v1130_v1  ;;  %v808_v1 = vld [vmem:[%s1464_s7] ss:$0 sm:$0xff] }
  0x87   : > { %847 = vmatpush3.bf16.msra.mxu0 %v950_v17 }
  0x89   : > { %867 = vmatpush3.bf16.msra.mxu1 %v958_v35 }
  0xf7   : > { %v387_v6 = vpop.xlane.xlu0 %386 }
  0xf8   : > { %v388_v7 = vmul.f32 0.03125, %v387_v6 }
  0xfa   : > { %v389_v9 = vsub.f32 %v378_v0, %v388_v7 }
  0xfc   : > { %v390_v10 = vmul.f32 %v1371_v8, %v389_v9 }
  0xfe   : > { %v391_v11 = vmul.f32 %v390_v10, %v390_v10 }
 0x100   : > { %392 = vadd.xlane.f32.xlu0 %v391_v11 }
 0x18d   : > { %v393_v18 = vpop.xlane.xlu0 %392 }
 0x18e   : > { %v394_v19 = vmul.f32 0.03125, %v393_v18 }
 0x190   : > { %v395_v20 = vadd.f32 1e-05, %v394_v19 }
 0x192   : > { %959 = vrsqrt.f32 %v395_v20 }
 0x19c   : > { %v960_v21 = vpop.eup %959 }
 0x19d   : > { %v397_v23 = vmul.f32 %v960_v21, %v390_v10 }
 0x19f   : > { %v404_v25 = vmul.f32 %v788_v22, %v397_v23 }
 0x1a1   : > { %v411_v26 = vadd.f32 %v789_v24, %v404_v25 }
 0x1a3   : > { %v412_v27 = vpack.c.bf16 %v411_v26, %v411_v26 }
 0x1a5   : > { %849 = vmatmul.mubr.bf16.vlgmr.msra.gmra.mrb[0].mxu0 %v412_v27 }
 0x278   : > { %v518_v37 = vpop.f32.mrb[0].mxu0 }
 0x279   : > { %v519_v38 = vadd.f32 %v790_v36, %v518_v37  ;;  %v850_v39 = vpop.f32.mrb[1].mxu0 }
 0x27a   : > { %v521_v40 = vpop.f32.mrb[2].mxu0 }
 0x27b   : > { %v524_v41 = vsub.f32 0.0, %v519_v38  ;;  %v851_v42 = vpop.f32.mrb[3].mxu0 }
 0x27d   : > { %v525_v43 = vmul.f32 1.442695, %v524_v41 }
 0x27f   : > { %961 = vpow2.f32 %v525_v43 }
 0x289   : > { %v962_v44 = vpop.eup %961 }
 0x28a   : > { %v527_v45 = vadd.f32 1.0, %v962_v44 }
 0x28c   : > { %963 = vrcp.f32 %v527_v45 }
 0x296   : > { %v964_v46 = vpop.eup %963 }
 0x297   : > { %v529_v47 = vmul.f32 %v964_v46, %v519_v38 }
 0x299   : > { %v530_v48 = vpack.c.bf16 %v529_v47, %v529_v47 }
 0x29b   : > { %869 = vmatmul.mubr.bf16.vlgmr.msra.gmra.mrb[0].mxu1 %v530_v48 }
 0x36e   : > { %v636_v50 = vpop.f32.mrb[0].mxu1 }
 0x36f   : > { %v637_v51 = vadd.f32 %v799_v49, %v636_v50  ;;  %v870_v52 = vpop.f32.mrb[1].mxu1 }
 0x370   : > { %v639_v53 = vpop.f32.mrb[2].mxu1 }
 0x371   : > { %v871_v54 = vpop.f32.mrb[3].mxu1  ;;  %v642_v55 = vadd.f32 %v637_v51, %v411_v26 }
 0x373   : > { %645 = vadd.xlane.f32.xlu1 %v642_v55 }
 0x400   : > { %v646_v56 = vpop.xlane.xlu1 %645 }
 0x401   : > { %v647_v57 = vmul.f32 0.03125, %v646_v56 }
 0x403   : > { %v648_v58 = vsub.f32 %v642_v55, %v647_v57 }
 0x405   : > { %v649_v59 = vmul.f32 %v1371_v8, %v648_v58 }
 0x407   : > { %v650_v60 = vmul.f32 %v649_v59, %v649_v59 }
 0x409   : > { %651 = vadd.xlane.f32.xlu1 %v650_v60 }
 0x496   : > { %v652_v61 = vpop.xlane.xlu1 %651 }
 0x497   : > { %v653_v62 = vmul.f32 0.03125, %v652_v61 }
 0x499   : > { %v654_v63 = vadd.f32 1e-05, %v653_v62 }
 0x49b   : > { %965 = vrsqrt.f32 %v654_v63 }
 0x4a5   : > { %v966_v0 = vpop.eup %965 }
 0x4a6   : > { %v656_v2 = vmul.f32 %v966_v0, %v649_v59 }
 0x4a8   : > { %v663_v4 = vmul.f32 %v808_v1, %v656_v2 }
 0x4aa   : > { %v670_v5 = vadd.f32 %v809_v3, %v663_v4 }
 0x4ac   : > { %671 = vst [vmem:[%s376_s14] sm:$0xff] %v670_v5 }
 0x4ad   : > { %1066 = shalt.err (!%p1063_p2)
}
 0x4ae   : > { %s1067_s25 = scalar_lea.hbm %s1413_s22, 128  ;;  %s1071_s17 = scalar_lea.hbm %s1466_s9, 256 }
 0x4af   : > { %p1068_p13 = scmp.ne.s32.totalorder %s1413_s22, %s1067_s25  ;;  %p1072_p4 = scmp.lt.u32.totalorder %s1413_s22, %s1466_s9 }
 0x4b0   : > { %p1073_p5 = scmp.lt.u32.totalorder %s1071_s17, %s1067_s25  ;;  %p1075_p11 = scmp.lt.u32.totalorder %s1067_s25, %s1413_s22 }
 0x4b1   : > { %p1069_p6 = pnand %p1068_p13, %p1482_p0 }
 0x4b2   : > { %p1074_p8 = por %p1073_p5, %p1072_p4 }
 0x4b3   : > { %p1070_p10 = pneg %p1069_p6 }
 0x4b4   : > { %p1076_p1 = por %p1075_p11, %p1074_p8 }
 0x4b6   : > { %p1077_p3 = pnand %p1076_p1, %p1070_p10 }
 0x4b8   : > { %1080 = shalt.err (!%p1077_p3)
}
 0x4b9   : > { %882 = dma.vmem_to_hbm [thread:$0]  (%p1482_p0), %s1415_s16, 128, %s1413_s22, %s673_s29  }
 0x4ba PF: > { %s1483_s20 = sld [smem:[#allocation12_spill]]  ;;  %s698_s21 = sand.u32 1, %s1111_s30  }
 0x4bb   : > { %p1485_p9 = scmp.ge.s32.totalorder %s1123_s12, 2  ;;  %s699_s13 = scalar_lea.sflag [#allocation4], %s698_s21 }
 0x4c0   : > { %p1484_p7 = scmp.ne.s32.totalorder %s1483_s20, 0 }
 0x4c2   : > { %p896_p12 = pnand %p1485_p9, %p1484_p7 }
 0x4c4   : > { %1106 = dma.done.wait (!%p896_p12), %s699_s13, 128  }
 0x4c5   : > { %1108 = vsyncadd (!%p896_p12), %s699_s13, 4294967168  ;;  %p23_p2 = scmp.ge.s32.totalorder %s1293_s24, 4   ;;  %s1486_s30 = smov %s1115_s10 }
 0x4c6   : > { %s1487_s10 = smov %s1119_s11  ;;  %s1488_s11 = smov %s1309_s27 }
 0x4c7   : > { %s1489_s12 = smov %s1293_s24  ;;  %25 = sbr.rel (!%p23_p2) target bundleno = 6 (0x6), region = 109 }
 0x4ce   :  { %704 = vsyncpa [#allocation3], 1 }
 0x4cf   :  { %706 = vsyncpa [#allocation3 + $0x1], 1 }
 0x4d0   :  { %707 = vsyncpa [#allocation6], 1 }
 0x4d1   :  { %708 = vsyncpa [#allocation4], 1 }
 0x4d2   :  { %710 = vsyncpa [#allocation4 + $0x1], 1 }

</bundles_post_ra>
